<compile_context>
chip_gen: v5e
topology: v5e:2x2
jax: 0.10.0
libtpu: 0.0.40
codegen_flags: <defaults>
</compile_context>

<pallas_src>
import functools

import jax
import jax.numpy as jnp
from jax.experimental import pallas as pl
from jax.experimental.pallas import tpu as pltpu


def pla_kernel(x_ref, w_ref, b_ref, gamma_ref, o_ref, *, m_pad, eps):
    """PositionLinearAttention forward for one batch tile.

    x_ref:     (TB, C, N) f32   -- flattened spatial, lane-dense N
    w_ref:     (R, C)  f32      -- fused [wq; wk; wv] slab (q/k rows zero-padded to m_pad)
    b_ref:     (R, 1)  f32      -- matching biases (padded rows zero)
    gamma_ref: (1,)    f32 in SMEM
    o_ref:     (TB, C, N) f32
    """
    gamma = gamma_ref[0]
    tb, _, n = x_ref.shape
    n_f = jnp.float32(n)

    # ---- One fused QKV projection for the whole batch tile ----------------
    # Lane-concat the TB (C, N) slices -> (C, TB*N) so the three 1x1 convs are
    # a single MXU matmul and the bias broadcast+add happens once per step.
    if tb == 1:
        x_all = x_ref[0]                                             # (C, N)
    else:
        x_all = jnp.concatenate([x_ref[bi] for bi in range(tb)], axis=1)
    qkv = jnp.dot(w_ref[...], x_all, preferred_element_type=jnp.float32) + b_ref[...]

    q_all = qkv[0:m_pad]               # (Mp, TB*N); padded rows are exactly 0
    k_all = qkv[m_pad:2 * m_pad]       # (Mp, TB*N)
    v_all = qkv[2 * m_pad:]            # (C,  TB*N)

    # l2 normalization along the channel axis (zero pad rows don't change the
    # norm).  rsqrt lowers to the EUP slot and co-issues with VPU/MXU work.
    qn_all = q_all * jax.lax.rsqrt(jnp.sum(q_all * q_all, axis=0, keepdims=True))
    kn_all = k_all * jax.lax.rsqrt(jnp.sum(k_all * k_all, axis=0, keepdims=True))

    # Transpose the *small* Kn once (XLU) so the per-batch V @ Kn^T below is a
    # plain MXU matmul and the large V operand never gets implicitly transposed.
    knT_all = kn_all.T                 # (TB*N, Mp)

    # ---- Per-batch reductions (global over N, so they stay per-sample) ----
    # TB is small by construction (default <= B // 2, keep <= ~4); a static
    # unroll is fine here, larger tiles would want lax.fori_loop to bound
    # live ranges.
    for bi in range(tb):
        lo = bi * n
        qn = qn_all[:, lo:lo + n]       # (Mp, N)  128-aligned lane slice
        kn = kn_all[:, lo:lo + n]       # (Mp, N)
        v = v_all[:, lo:lo + n]         # (C,  N)
        knT = knT_all[lo:lo + n, :]     # (N, Mp)  8-aligned sublane slice
        xb = x_all[:, lo:lo + n]        # (C,  N)

        # tailor = 1 / (N + Qn^T . (sum_n Kn + eps)) -- tiny contraction over
        # Mp done as broadcast-mul + sublane reduce (VPU/XLU, no MXU traffic).
        k_sum = jnp.sum(kn, axis=1, keepdims=True) + eps              # (Mp, 1)
        qk = jnp.sum(qn * k_sum, axis=0, keepdims=True)               # (1, N)
        # approx=True (EUP vrcp) is the faster variant but its error budget is
        # marginal against the 1e-4 reference check, so keep the exact divide.
        tailor = pl.reciprocal(n_f + qk, approx=False)                # (1, N)

        v_sum = jnp.sum(v, axis=1, keepdims=True)                     # (C, 1)
        kv = jnp.dot(v, knT, preferred_element_type=jnp.float32)      # (C, Mp)
        qm = jnp.dot(kv, qn, preferred_element_type=jnp.float32)      # (C, N)

        o_ref[bi] = xb + gamma * ((v_sum + qm) * tailor)


def pack_qkv_params(wq, bq, wk, bk, wv, bv):
    """Pack the three 1x1-conv weights/biases into one 8-row-aligned slab.

    Call ONCE at parameter-load time (not per forward): the scatter ops and
    their HBM round-trips are a visible fraction of wall time at these sizes.
    Padded Q/K rows are zero so they produce all-zero Q/K channels that cancel
    out of every reduction.
    """
    M, C = wq.shape
    Mp = max(8, ((M + 7) // 8) * 8)
    R = 2 * Mp + C
    w_all = jnp.zeros((R, C), jnp.float32)
    w_all = w_all.at[0:M].set(wq.astype(jnp.float32))
    w_all = w_all.at[Mp:Mp + M].set(wk.astype(jnp.float32))
    w_all = w_all.at[2 * Mp:2 * Mp + C].set(wv.astype(jnp.float32))
    b_all = jnp.zeros((R, 1), jnp.float32)
    b_all = b_all.at[0:M, 0].set(bq.astype(jnp.float32))
    b_all = b_all.at[Mp:Mp + M, 0].set(bk.astype(jnp.float32))
    b_all = b_all.at[2 * Mp:2 * Mp + C, 0].set(bv.astype(jnp.float32))
    return w_all, b_all, Mp


def position_linear_attention_pallas(x_nchw, w_all, b_all, gamma, m_pad,
                                     *, eps=1e-6, batch_tile=None):
    B, C, H, W = x_nchw.shape
    N = H * W
    R = w_all.shape[0]

    x = x_nchw.reshape(B, C, N).astype(jnp.float32)
    gamma_arr = jnp.asarray(gamma, jnp.float32).reshape(1)

    # Batch tiling:
    #  * Default gives >= 2 grid steps for B > 1 so the "parallel" axis can be
    #    sharded across v7x's two TensorCores; on single-TC v5e/v6e the extra
    #    step costs ~0.35 us (pass batch_tile=B there to use one big block).
    #  * VMEM budget per step: ~2 (double-buffer) * 2 (in+out) * TB*C*N*4 B
    #    plus the (R, C) weight slab; size TB against the 32 MiB scoped VMEM
    #    default (64 MiB physical on v7x, 128 MiB on v5e/v6e).  Keep TB <= ~4:
    #    the kernel statically unrolls the batch loop.
    if batch_tile is None:
        batch_tile = B // 2 if (B % 2 == 0 and B > 1) else 1
    TB = batch_tile
    assert B % TB == 0, "batch_tile must divide the batch size"
    grid = (B // TB,)

    kernel = functools.partial(pla_kernel, m_pad=m_pad, eps=float(eps))

    out = pl.pallas_call(
        kernel,
        out_shape=jax.ShapeDtypeStruct((B, C, N), jnp.float32),
        grid_spec=pltpu.PrefetchScalarGridSpec(
            num_scalar_prefetch=0,
            grid=grid,
            in_specs=[
                pl.BlockSpec((TB, C, N), lambda i: (i, 0, 0)),        # x batch tile
                pl.BlockSpec((R, C), lambda i: (0, 0)),               # fused QKV weights
                pl.BlockSpec((R, 1), lambda i: (0, 0)),               # fused QKV biases
                pl.BlockSpec(memory_space=pltpu.MemorySpace.SMEM),    # gamma scalar
            ],
            out_specs=pl.BlockSpec((TB, C, N), lambda i: (i, 0, 0)),
        ),
        compiler_params=pltpu.CompilerParams(
            dimension_semantics=("parallel",)),
    )(x, w_all, b_all, gamma_arr)

    return out.reshape(B, C, H, W)


def position_linear_attention_ref(x, wq, bq, wk, bk, wv, bv, gamma, eps=1e-6):
    # Pure-JAX reference mirroring the PyTorch forward (H == W so the final
    # .view(B, C, height, width) is a plain reshape).
    B, C, H, W = x.shape
    N = W * H
    xf = x.reshape(B, C, N)

    Q = jnp.einsum('mc,bcn->bmn', wq, xf) + bq[None, :, None]   # (B, M, N)
    K = jnp.einsum('mc,bcn->bmn', wk, xf) + bk[None, :, None]   # (B, M, N)
    V = jnp.einsum('oc,bcn->bon', wv, xf) + bv[None, :, None]   # (B, C, N)

    Qn = Q * (1.0 / jnp.sqrt(jnp.sum(Q * Q, axis=-2, keepdims=True)))
    Kn = K * (1.0 / jnp.sqrt(jnp.sum(K * K, axis=-2, keepdims=True)))
    Qp = jnp.transpose(Qn, (0, 2, 1))                            # (B, N, M)

    tailor = 1.0 / (N + jnp.einsum('bnm,bm->bn', Qp, jnp.sum(Kn, axis=-1) + eps))
    value_sum = jnp.sum(V, axis=-1)[:, :, None]                  # (B, C, 1)
    matrix = jnp.einsum('bmn,bcn->bmc', Kn, V)                   # (B, M, C)
    matrix_sum = value_sum + jnp.einsum('bnm,bmc->bcn', Qp, matrix)
    weight_value = (matrix_sum * tailor[:, None, :]).reshape(B, C, H, W)
    return x + gamma * weight_value


if __name__ == "__main__":
    # Module config: in_places = 32 -> query/key channels = 32 // 8 = 4.
    B, C, H, W = 2, 32, 16, 16
    M = C // 8

    key = jax.random.PRNGKey(0)
    kx, kwq, kbq, kwk, kbk, kwv, kbv = jax.random.split(key, 7)

    x = jax.random.normal(kx, (B, C, H, W), dtype=jnp.float32)

    # 1x1 Conv2d weights as (out_ch, in_ch) matrices, PyTorch-style uniform init.
    bound = 1.0 / (C ** 0.5)
    wq = jax.random.uniform(kwq, (M, C), jnp.float32, -bound, bound)
    bq = jax.random.uniform(kbq, (M,), jnp.float32, -bound, bound)
    wk = jax.random.uniform(kwk, (M, C), jnp.float32, -bound, bound)
    bk = jax.random.uniform(kbk, (M,), jnp.float32, -bound, bound)
    wv = jax.random.uniform(kwv, (C, C), jnp.float32, -bound, bound)
    bv = jax.random.uniform(kbv, (C,), jnp.float32, -bound, bound)

    # nn.Parameter(torch.zeros(1)) initializes gamma to 0 (output == x); use a
    # nonzero value so the attention path is actually exercised and checked.
    gamma = jnp.float32(0.5)

    # Pack the fused QKV weight/bias slabs once (parameter-load time).
    w_all, b_all, m_pad = pack_qkv_params(wq, bq, wk, bk, wv, bv)

    y = position_linear_attention_pallas(x, w_all, b_all, gamma, m_pad)
    y = jax.block_until_ready(y)

    y_ref = position_linear_attention_ref(x, wq, bq, wk, bk, wv, bv, gamma)
    assert jnp.allclose(y, y_ref, atol=1e-4, rtol=1e-4), "mismatch vs reference"

    print("KERNEL_OK")
</pallas_src>

<mosaic_0001>
module attributes {stable_mosaic.version = 11 : i64} {
  func.func @pla_kernel(%arg0: i32, %arg1: memref<1x32x256xf32, #tpu.memory_space<vmem>>, %arg2: memref<48x32xf32, #tpu.memory_space<vmem>>, %arg3: memref<48x1xf32, #tpu.memory_space<vmem>>, %arg4: memref<1xf32, #tpu.memory_space<smem>>, %arg5: memref<1x32x256xf32, #tpu.memory_space<vmem>>) attributes {dimension_semantics = [#tpu.dimension_semantics<parallel>], iteration_bounds = array<i64: 2>, scalar_prefetch = 0 : i64, scratch_operands = 0 : i64, tpu.core_type = #tpu.core_type<tc>, window_params = [{transform_indices = @transform_0, window_bounds = array<i64: 1, 32, 256>}, {pipeline_mode = #tpu.pipeline_mode<synchronous>, transform_indices = @transform_1, window_bounds = array<i64: 48, 32>}, {pipeline_mode = #tpu.pipeline_mode<synchronous>, transform_indices = @transform_2, window_bounds = array<i64: 48, 1>}, {transform_indices = @transform_3, window_bounds = array<i64: 1>}, {transform_indices = @transform_4, window_bounds = array<i64: 1, 32, 256>}]} {
    %c0 = arith.constant 0 : index
    %0 = memref.load %arg4[%c0] : memref<1xf32, #tpu.memory_space<smem>>
    %c0_0 = arith.constant 0 : index
    %c0_1 = arith.constant 0 : index
    %c0_2 = arith.constant 0 : index
    %1 = vector.load %arg1[%c0_0, %c0_1, %c0_2] : memref<1x32x256xf32, #tpu.memory_space<vmem>>, vector<1x32x256xf32>
    %2 = vector.shape_cast %1 : vector<1x32x256xf32> to vector<32x256xf32>
    %c0_3 = arith.constant 0 : index
    %c0_4 = arith.constant 0 : index
    %3 = vector.load %arg2[%c0_3, %c0_4] : memref<48x32xf32, #tpu.memory_space<vmem>>, vector<48x32xf32>
    %cst = arith.constant dense<0.000000e+00> : vector<48x256xf32>
    %4 = tpu.matmul %3, %2, %cst {dimension_numbers = #tpu.dot_dimension_numbers<[1], [0], [0], [1], [0, 0, 1, 1], [], []>} : vector<48x32xf32>, vector<32x256xf32>, vector<48x256xf32> -> vector<48x256xf32>
    %c0_5 = arith.constant 0 : index
    %c0_6 = arith.constant 0 : index
    %5 = vector.load %arg3[%c0_5, %c0_6] : memref<48x1xf32, #tpu.memory_space<vmem>>, vector<48x1xf32>
    %6 = vector.broadcast %5 : vector<48x1xf32> to vector<48x256xf32>
    %7 = arith.addf %4, %6 : vector<48x256xf32>
    %8 = vector.extract_strided_slice %7 {offsets = [0, 0], sizes = [8, 256], strides = [1, 1]} : vector<48x256xf32> to vector<8x256xf32>
    %9 = vector.extract_strided_slice %7 {offsets = [8, 0], sizes = [8, 256], strides = [1, 1]} : vector<48x256xf32> to vector<8x256xf32>
    %10 = vector.extract_strided_slice %7 {offsets = [16, 0], sizes = [32, 256], strides = [1, 1]} : vector<48x256xf32> to vector<32x256xf32>
    %11 = arith.mulf %8, %8 : vector<8x256xf32>
    %cst_7 = arith.constant dense<0.000000e+00> : vector<256xf32>
    %12 = vector.multi_reduction <add>, %11, %cst_7 [0] : vector<8x256xf32> to vector<256xf32>
    %13 = vector.shape_cast %12 : vector<256xf32> to vector<1x256xf32>
    %14 = math.rsqrt %13 : vector<1x256xf32>
    %15 = vector.broadcast %14 : vector<1x256xf32> to vector<8x256xf32>
    %16 = arith.mulf %8, %15 : vector<8x256xf32>
    %17 = arith.mulf %9, %9 : vector<8x256xf32>
    %cst_8 = arith.constant dense<0.000000e+00> : vector<256xf32>
    %18 = vector.multi_reduction <add>, %17, %cst_8 [0] : vector<8x256xf32> to vector<256xf32>
    %19 = vector.shape_cast %18 : vector<256xf32> to vector<1x256xf32>
    %20 = math.rsqrt %19 : vector<1x256xf32>
    %21 = vector.broadcast %20 : vector<1x256xf32> to vector<8x256xf32>
    %22 = arith.mulf %9, %21 : vector<8x256xf32>
    %23 = tpu.transpose %22, [1, 0] : vector<8x256xf32> -> vector<256x8xf32>
    %cst_9 = arith.constant dense<0.000000e+00> : vector<8xf32>
    %24 = vector.multi_reduction <add>, %22, %cst_9 [1] : vector<8x256xf32> to vector<8xf32>
    %25 = vector.shape_cast %24 : vector<8xf32> to vector<8x1xf32>
    %cst_10 = arith.constant 9.99999997E-7 : f32
    %26 = vector.broadcast %cst_10 : f32 to vector<8x1xf32>
    %27 = arith.addf %25, %26 : vector<8x1xf32>
    %28 = vector.broadcast %27 : vector<8x1xf32> to vector<8x256xf32>
    %29 = arith.mulf %16, %28 : vector<8x256xf32>
    %cst_11 = arith.constant dense<0.000000e+00> : vector<256xf32>
    %30 = vector.multi_reduction <add>, %29, %cst_11 [0] : vector<8x256xf32> to vector<256xf32>
    %31 = vector.shape_cast %30 : vector<256xf32> to vector<1x256xf32>
    %cst_12 = arith.constant 2.560000e+02 : f32
    %32 = vector.broadcast %cst_12 : f32 to vector<1x256xf32>
    %33 = arith.addf %32, %31 : vector<1x256xf32>
    %34 = tpu.reciprocal %33 : vector<1x256xf32> -> vector<1x256xf32>
    %cst_13 = arith.constant dense<0.000000e+00> : vector<32xf32>
    %35 = vector.multi_reduction <add>, %10, %cst_13 [1] : vector<32x256xf32> to vector<32xf32>
    %36 = vector.shape_cast %35 : vector<32xf32> to vector<32x1xf32>
    %cst_14 = arith.constant dense<0.000000e+00> : vector<32x8xf32>
    %37 = tpu.matmul %10, %23, %cst_14 {dimension_numbers = #tpu.dot_dimension_numbers<[1], [0], [0], [1], [0, 0, 1, 1], [], []>} : vector<32x256xf32>, vector<256x8xf32>, vector<32x8xf32> -> vector<32x8xf32>
    %cst_15 = arith.constant dense<0.000000e+00> : vector<32x256xf32>
    %38 = tpu.matmul %37, %16, %cst_15 {dimension_numbers = #tpu.dot_dimension_numbers<[1], [0], [0], [1], [0, 0, 1, 1], [], []>} : vector<32x8xf32>, vector<8x256xf32>, vector<32x256xf32> -> vector<32x256xf32>
    %39 = vector.broadcast %36 : vector<32x1xf32> to vector<32x256xf32>
    %40 = arith.addf %39, %38 : vector<32x256xf32>
    %41 = vector.broadcast %34 : vector<1x256xf32> to vector<32x256xf32>
    %42 = arith.mulf %40, %41 : vector<32x256xf32>
    %43 = vector.broadcast %0 : f32 to vector<32x256xf32>
    %44 = arith.mulf %43, %42 : vector<32x256xf32>
    %45 = arith.addf %2, %44 : vector<32x256xf32>
    %c0_16 = arith.constant 0 : index
    %c0_17 = arith.constant 0 : index
    %c0_18 = arith.constant 0 : index
    %46 = vector.load %arg5[%c0_16, %c0_17, %c0_18] : memref<1x32x256xf32, #tpu.memory_space<vmem>>, vector<1x32x256xf32>
    %47 = vector.shape_cast %46 : vector<1x32x256xf32> to vector<32x256xf32>
    %48 = vector.shape_cast %45 : vector<32x256xf32> to vector<1x32x256xf32>
    tpu.vector_store %arg5[%c0_16, %c0_17, %c0_18], %48 {strides = array<i32>} : memref<1x32x256xf32, #tpu.memory_space<vmem>>, vector<1x32x256xf32>,
    return
  }
  func.func @transform_0(%arg0: i32) -> (i32, i32, i32) {
    %c0_i32 = arith.constant 0 : i32
    %c0_i32_0 = arith.constant 0 : i32
    %c0_i32_1 = arith.constant 0 : i32
    return %arg0, %c0_i32, %c0_i32_0 : i32, i32, i32
  }
  func.func @transform_1(%arg0: i32) -> (i32, i32) {
    %c0_i32 = arith.constant 0 : i32
    %c0_i32_0 = arith.constant 0 : i32
    %c0_i32_1 = arith.constant 0 : i32
    return %c0_i32, %c0_i32_0 : i32, i32
  }
  func.func @transform_2(%arg0: i32) -> (i32, i32) {
    %c0_i32 = arith.constant 0 : i32
    %c0_i32_0 = arith.constant 0 : i32
    %c0_i32_1 = arith.constant 0 : i32
    return %c0_i32, %c0_i32_0 : i32, i32
  }
  func.func @transform_3(%arg0: i32) -> i32 {
    %c0_i32 = arith.constant 0 : i32
    %c0_i32_0 = arith.constant 0 : i32
    return %c0_i32 : i32
  }
  func.func @transform_4(%arg0: i32) -> (i32, i32, i32) {
    %c0_i32 = arith.constant 0 : i32
    %c0_i32_0 = arith.constant 0 : i32
    %c0_i32_1 = arith.constant 0 : i32
    return %arg0, %c0_i32, %c0_i32_0 : i32, i32, i32
  }
}

</mosaic_0001>

<bundles_post_ra>
// kernel: tpu_custom_call.1
= control target key start
LH: loop header
LB: loop body
LE: loop exit
PB: predicated region body
PF: predicated region fallthrough
CT: control target
= control target key end

     0   :  { %s1153_s0 = inlined_call_operand.vmem [shape: f32[2,32,256], index: 0, kind: input, shape index: {}]   ;;  %s1154_s1 = inlined_call_operand.vmem [shape: f32[48,32], index: 1, kind: input, shape index: {}]   ;;  %s1155_s2 = inlined_call_operand.vmem [shape: f32[48,1], index: 2, kind: input, shape index: {}]   ;;  %s1156_s3 = inlined_call_operand.<no memory space> [shape: f32[1], index: 3, kind: input, shape index: {}]   ;;  %s1157_s4 = inlined_call_operand.hbm [shape: f32[2,32,256], index: 4, kind: output, shape index: {}]  }
   0x1   :  { %9 = sst [smem:[#allocation2]] %s1156_s3 }
   0x2   :  { %10 = vsyncpa [#allocation4], 0 }
   0x3   :  { %12 = vsyncpa [#allocation4 + $0x1], 0  ;;  %s903_s17 = smov 0   ;;  %s905_s18 = smov 0  }
   0x4   :  { %s907_s19 = smov 0   ;;  %s909_s20 = smov 0  }
   0x5 LB: > { %s924_s3 = sadd.s32 4294967295, %s870_s20   ;;  %s717_s21 = sadd.s32 4294967294, %s870_s20   ;;  %s870_s20 = sphi %s909_s20, %s1167_s20   ;;  %s866_s19 = sphi %s907_s19, %s1166_s19   ;;  %s862_s18 = sphi %s905_s18, %s1165_s18   ;;  %s858_s17 = sphi %s903_s17, %s1164_s17  }
   0x6   : > { %s928_s22 = sadd.s32 1, %s870_s20   ;;  %s114_s23 = sadd.s32 1, %s866_s19 }
   0x7   : > { %s111_s24 = ssub.s32 %s870_s20, %s928_s22  ;;  %p124_p0 = scmp.ne.s32.totalorder %s866_s19, %s862_s18 }
   0x8   : > { %p112_p1 = scmp.eq.s32.totalorder %s111_s24, 0  ;;  %p125_p2 = scmp.eq.s32.totalorder %s924_s3, 1 }
   0x9   : > { %p130_p3 = scmp.ne.s32.totalorder %s862_s18, %s858_s17  ;;  %p131_p4 = scmp.eq.s32.totalorder %s717_s21, 1 }
   0xa   : > { %s939_s25 = scalar_select %p112_p1, %s866_s19, %s114_s23  }
   0xb   : > { %p941_p5 = por %p125_p2, %p124_p0  ;;  %p945_p6 = por %p131_p4, %p130_p3 }
   0xc   : > { %p720_p7 = scmp.ge.s32.totalorder %s870_s20, 1  ;;  %p166_p8 = scmp.lt.s32.totalorder %s870_s20, 3 }
   0xe   : > { %p167_p9 = pnand %p720_p7, %p166_p8 }
   0xf   : > { %p192_p10 = scmp.lt.s32.totalorder (!%p167_p9), %s924_s3, 1  ;;  %s197_s13 = sld [smem:[#allocation2]] (!%p167_p9) }
  0x10   : > { %170 = sbr.rel (%p167_p9) target bundleno = 510 (0x1fe), region = 36  ;;  %s189_s14 = sand.u32 (!%p167_p9), 1, %s862_s18  }
  0x11   : > { %s721_s15 = sshll.u32 (!%p167_p9), %s189_s14, 6  ;;  %s750_s21 = sshll.u32 (!%p167_p9), %s924_s3, 6 }
  0x12   : > { %s1103_s16 = scalar_lea.vmem (!%p167_p9), [#allocation3], %s721_s15  ;;  %s651_s28 = scalar_lea.hbm (!%p167_p9), %s1157_s4, %s750_s21 }
  0x13   : > { %s654_s29 = sshll.u32 (!%p167_p9), %s651_s28, 4  ;;  %s640_s30 = scalar_lea.sflag (!%p167_p9), [#allocation4], %s189_s14  ;;  %s655_s29 = int_to_ptr.hbm [resolvable:$true] %s654_s29 }
  0x14   : > { %s822_s5 = sshra.s32 (!%p167_p9), %s655_s29, 4  ;;  %s828_s9 = scalar_lea.hbm (!%p167_p9), %s1157_s4, 128  ;;  %s823_s5 = int_to_ptr.hbm [resolvable:$true] %s822_s5 }
  0x15   : > { %v213_v0 = vld [vmem:[%s1155_s2 + $0x8] sm:$0xff]  ;;  %v872_v1 = vmov 0   ;;  %s193_s6 = scalar_select %p192_p10, %s924_s3, 1  ;;  %v214_v7 = vld [vmem:[%s1155_s2 + $0x10] sm:$0xff]  ;;  %v212_v8 = vld [vmem:[%s1155_s2] sm:$0xff]  ;;  %vm248_vm0 = vcmask 261120  }
  0x16   : > { %793 = vset.pattern.permute.xlu0 %v872_v1  ;;  %795 = vset.pattern.permute.xlu2 %v872_v1  ;;  %v217_v2 = vld [vmem:[%s1155_s2 + $0x28] sm:$0xff]  ;;  %v206_v13 = vld [vmem:[%s1154_s1] sm:$0xff]  ;;  %v215_v14 = vld [vmem:[%s1155_s2 + $0x18] sm:$0xff]  ;;  %vm527_vm13 = vcmask 64512   ;;  %s652_s3 = sshll.u32 %s1103_s16, 4  ;;  %p829_p0 = scmp.lt.s32.totalorder %s823_s5, %s1157_s4  ;;  %s653_s3 = int_to_ptr.vmem [resolvable:$true] %s652_s3 }
  0x17   : > { %225 = vperm.xlu0 %793, %v213_v0   ;;  %245 = vperm.xlu2 %795, %v217_v2   ;;  %s749_s7 = sshll.u32 %s193_s6, 6  ;;  %v207_v15 = vld [vmem:[%s1154_s1 + $0x8] sm:$0xff]  ;;  %v216_v16 = vld [vmem:[%s1155_s2 + $0x20] sm:$0xff]  ;;  %v208_v17 = vld [vmem:[%s1154_s1 + $0x10] sm:$0xff]  ;;  %s824_s6 = scalar_lea.hbm %s823_s5, 64 }
  0x18   : > { %794 = vset.pattern.permute.xlu1 %v872_v1  ;;  %s196_s10 = scalar_lea.vmem %s1153_s0, %s749_s7  ;;  %v209_v18 = vld [vmem:[%s1154_s1 + $0x18] sm:$0xff]  ;;  %v210_v19 = vld [vmem:[%s1154_s1 + $0x20] sm:$0xff]  ;;  %v211_v20 = vld [vmem:[%s1154_s1 + $0x28] sm:$0xff]  ;;  %p825_p11 = scmp.ne.s32.totalorder %s823_s5, %s824_s6 }
  0x19   : > { %v962_v3 = vld [vmem:[%s196_s10 + $0x30] sm:$0xff]  ;;  %v964_v4 = vld [vmem:[%s196_s10 + $0x38] sm:$0xff]  ;;  %v966_v5 = vld [vmem:[%s196_s10 + $0x20] sm:$0xff]  ;;  %235 = vperm.xlu1 %794, %v215_v14   ;;  %p830_p1 = scmp.lt.s32.totalorder %s828_s9, %s824_s6 }
  0x1a   : > { %279 = vmatpush.msra.mxu0 %v962_v3  ;;  %314 = vmatpush.msra.mxu1 %v964_v4  ;;  %v970_v6 = vld [vmem:[%s196_s10 + $0x28] sm:$0xff]  ;;  %v978_v9 = vld [vmem:[%s196_s10 + $0x10] sm:$0xff]  ;;  %v980_v10 = vld [vmem:[%s196_s10 + $0x18] sm:$0xff]  ;;  %p826_p12 = pnand %p825_p11, %p941_p5 }
  0x1b   : > { %v984_v11 = vld [vmem:[%s196_s10] sm:$0xff]  ;;  %v986_v12 = vld [vmem:[%s196_s10 + $0x8] sm:$0xff]  ;;  %p831_p2 = por %p830_p1, %p829_p0 }
  0x1c   : > { %280 = vmatpush.msra.mxu0 %v966_v5  ;;  %315 = vmatpush.msra.mxu1 %v970_v6  ;;  %p827_p13 = pneg %p826_p12 }
  0x1e   : > { %281 = vmatpush.msra.mxu0 %v978_v9  ;;  %316 = vmatpush.msra.mxu1 %v980_v10  ;;  %p832_p3 = pnand %p831_p2, %p827_p13 }
  0x1f   : > { %230 = vperm.xlu0 %793, %v214_v7   ;;  %220 = vperm.xlu2 %795, %v212_v8  }
  0x20   : > { %282 = vmatpush.msra.mxu0 %v984_v11  ;;  %317 = vmatpush.msra.mxu1 %v986_v12 }
  0x21   : > { %724 = vmatmul.msk.f32.vlgmr.msra.gmra.mxu0 %vm248_vm0, %v206_v13  ;;  %730 = vmatmul.msk.f32.vlgmr.msra.gmra.mxu1 %vm248_vm0, %v206_v13 }
  0x22   : > { %240 = vperm.xlu1 %794, %v216_v16  }
  0x29   : > { %725 = vmatmul.msk.f32.gmra.mxu0 %vm248_vm0, %v207_v15  ;;  %731 = vmatmul.msk.f32.gmra.mxu1 %vm248_vm0, %v207_v15 }
  0x31   : > { %726 = vmatmul.msk.f32.gmra.mxu0 %vm248_vm0, %v208_v17  ;;  %732 = vmatmul.msk.f32.gmra.mxu1 %vm248_vm0, %v208_v17 }
  0x39   : > { %727 = vmatmul.msk.f32.gmra.mxu0 %vm248_vm0, %v209_v18  ;;  %733 = vmatmul.msk.f32.gmra.mxu1 %vm248_vm0, %v209_v18 }
  0x41   : > { %728 = vmatmul.msk.f32.gmra.mxu0 %vm248_vm0, %v210_v19  ;;  %734 = vmatmul.msk.f32.gmra.mxu1 %vm248_vm0, %v210_v19 }
  0x49   : > { %729 = vmatmul.msk.f32.gmra.mxu0 %vm248_vm0, %v211_v20  ;;  %735 = vmatmul.msk.f32.gmra.mxu1 %vm248_vm0, %v211_v20 }
  0x71   : > { %v1028_v21 = vpop.permute.xlu2 %245 }
  0x79   : > { %v221_v22 = vpop.permute.xlu2 %220 }
  0x89   : > { %v226_v29 = vpop.permute.xlu0 %225 }
  0x8b   : > { %v236_v62 = vpop.permute.xlu1 %235 }
  0x91   : > { %v231_v50 = vpop.permute.xlu0 %230 }
  0x9e   : > { %v284_v23 = vpop.f32.mrf.mxu0  ;;  %v319_v24 = vpop.f32.mrf.mxu1 }
  0x9f   : > { %v1030_v25 = vadd.f32 %v284_v23, %v221_v22  ;;  %v1032_v26 = vadd.f32 %v319_v24, %v221_v22 }
  0xa1   : > { %v337_v27 = vmul.f32 %v1030_v25, %v1030_v25  ;;  %v338_v28 = vmul.f32 %v1032_v26, %v1032_v26 }
  0xa3   : > { %v339_v30 = vrot.slane %v337_v27, 4  ;;  %v345_v31 = vrot.slane %v338_v28, 4 }
  0xa5   : > { %v340_v32 = vadd.f32 %v339_v30, %v337_v27  ;;  %v346_v33 = vadd.f32 %v345_v31, %v338_v28  ;;  %v241_v27 = vpop.permute.xlu1 %240 }
  0xa6   : > { %v287_v34 = vpop.f32.mrf.mxu0  ;;  %v322_v35 = vpop.f32.mrf.mxu1 }
  0xa7   : > { %v341_v36 = vrot.slane %v340_v32, 2  ;;  %v347_v37 = vrot.slane %v346_v33, 2  ;;  %v1038_v38 = vadd.f32 %v287_v34, %v226_v29  ;;  %v1040_v39 = vadd.f32 %v322_v35, %v226_v29 }
  0xa9   : > { %v342_v40 = vadd.f32 %v341_v36, %v340_v32  ;;  %v348_v41 = vadd.f32 %v347_v37, %v346_v33  ;;  %v373_v42 = vmul.f32 %v1038_v38, %v1038_v38  ;;  %v374_v43 = vmul.f32 %v1040_v39, %v1040_v39 }
  0xab   : > { %v343_v44 = vrot.slane %v342_v40, 1  ;;  %v349_v45 = vrot.slane %v348_v41, 1  ;;  %v375_v46 = vrot.slane %v373_v42, 4  ;;  %v381_v47 = vrot.slane %v374_v43, 4 }
  0xad   : > { %v1046_v48 = vadd.f32 %v343_v44, %v342_v40  ;;  %v1048_v49 = vadd.f32 %v349_v45, %v348_v41  ;;  %v376_v51 = vadd.f32 %v375_v46, %v373_v42  ;;  %v382_v52 = vadd.f32 %v381_v47, %v374_v43 }
  0xae   : > { %v290_v53 = vpop.f32.mrf.mxu0  ;;  %v325_v54 = vpop.f32.mrf.mxu1 }
  0xaf   : > { %796 = vrsqrt.f32 %v1046_v48  ;;  %v377_v55 = vrot.slane %v376_v51, 2  ;;  %v383_v56 = vrot.slane %v382_v52, 2  ;;  %v1051_v57 = vadd.f32 %v290_v53, %v231_v50 }
  0xb0   : > { %798 = vrsqrt.f32 %v1048_v49  ;;  %v1054_v58 = vadd.f32 %v325_v54, %v231_v50  ;;  %vm357_vm4 = vweird.f32 %v1046_v48  ;;  %vm367_vm7 = vweird.f32 %v1048_v49 }
  0xb1   : > { %v378_v59 = vadd.f32 %v377_v55, %v376_v51  ;;  %v384_v60 = vadd.f32 %v383_v56, %v382_v52 }
  0xb2   : > { %v457_v61 = vadd.f32 %v1054_v58, %v1051_v57 }
  0xb3   : > { %v379_v63 = vrot.slane %v378_v59, 1  ;;  %v385_v0 = vrot.slane %v384_v60, 1 }
  0xb4   : > { %458 = vadd.xlane.f32.xlu1 %v457_v61 }
  0xb5   : > { %v797_v1 = vpop.eup %796  ;;  %v380_v2 = vadd.f32 %v379_v63, %v378_v59  ;;  %v386_v7 = vadd.f32 %v385_v0, %v384_v60 }
  0xb6   : > { %v799_v8 = vpop.eup %798  ;;  %v293_v13 = vpop.f32.mrf.mxu0  ;;  %v352_v15 = vmul.f32 %v797_v1, %v1046_v48  ;;  %vm358_vm1 = vweird.f32 %v797_v1 }
  0xb7   : > { %v328_v14 = vpop.f32.mrf.mxu1  ;;  %800 = vrsqrt.f32 %v380_v2  ;;  %v1059_v16 = vadd.f32 %v293_v13, %v236_v62  ;;  %v362_v19 = vmul.f32 %v799_v8, %v1048_v49  ;;  %vm368_vm2 = vweird.f32 %v799_v8  ;;  %vm359_vm6 = vmor %vm357_vm4, %vm358_vm1 }
  0xb8   : > { %v1061_v17 = vadd.f32 %v328_v14, %v236_v62  ;;  %802 = vrsqrt.f32 %v386_v7  ;;  %v353_v18 = vmul.f32 %v797_v1, %v352_v15  ;;  %vm393_vm8 = vweird.f32 %v380_v2  ;;  %vm369_vm9 = vmor %vm367_vm7, %vm368_vm2 }
  0xb9   : > { %v363_v22 = vmul.f32 %v799_v8, %v362_v19  ;;  %vm403_vm11 = vweird.f32 %v386_v7 }
  0xba   : > { %v460_v20 = vadd.f32 %v1061_v17, %v1059_v16  ;;  %v354_v23 = vmul.f32 0.5, %v353_v18 }
  0xbb   : > { %v364_v24 = vmul.f32 0.5, %v363_v22 }
  0xbc   : > { %461 = vadd.xlane.f32.xlu2 %v460_v20  ;;  %v355_v34 = vsub.f32 1.5, %v354_v23 }
  0xbd   : > { %v801_v28 = vpop.eup %800  ;;  %v365_v40 = vsub.f32 1.5, %v364_v24 }
  0xbe   : > { %v803_v29 = vpop.eup %802  ;;  %v388_v30 = vmul.f32 %v801_v28, %v380_v2  ;;  %v296_v31 = vpop.f32.mrf.mxu0  ;;  %v356_v45 = vmul.f32 %v797_v1, %v355_v34  ;;  %vm394_vm3 = vweird.f32 %v801_v28 }
  0xbf   : > { %v331_v32 = vpop.f32.mrf.mxu1  ;;  %v398_v33 = vmul.f32 %v803_v29, %v386_v7  ;;  %v297_v35 = vadd.f32 %v296_v31, %v241_v27  ;;  %v366_v47 = vmul.f32 %v799_v8, %v365_v40  ;;  %vm404_vm5 = vweird.f32 %v803_v29  ;;  %vm395_vm10 = vmor %vm393_vm8, %vm394_vm3 }
  0xc0   : > { %v332_v36 = vadd.f32 %v331_v32, %v241_v27  ;;  %v389_v37 = vmul.f32 %v801_v28, %v388_v30  ;;  %v360_v53 = vsel %vm359_vm6, %v797_v1, %v356_v45  ;;  %vm405_vm12 = vmor %vm403_vm11, %vm404_vm5 }
  0xc1   : > { %v399_v41 = vmul.f32 %v803_v29, %v398_v33  ;;  %v370_v55 = vsel %vm369_vm9, %v799_v8, %v366_v47  ;;  %v371_v60 = vmul.f32 %v360_v53, %v1030_v25 }
  0xc2   : > { %v463_v42 = vadd.f32 %v332_v36, %v297_v35  ;;  %v390_v43 = vmul.f32 0.5, %v389_v37  ;;  %v372_v49 = vmul.f32 %v370_v55, %v1032_v26 }
  0xc3   : > { %v400_v44 = vmul.f32 0.5, %v399_v41 }
  0xc4   : > { %464 = vadd.xlane.f32.xlu2 %v463_v42  ;;  %v391_v46 = vsub.f32 1.5, %v390_v43 }
  0xc5   : > { %v401_v50 = vsub.f32 1.5, %v400_v44 }
  0xc6   : > { %v392_v51 = vmul.f32 %v801_v28, %v391_v46  ;;  %v299_v61 = vpop.f32.mrf.mxu0 }
  0xc7   : > { %v402_v52 = vmul.f32 %v803_v29, %v401_v50  ;;  %v334_v62 = vpop.f32.mrf.mxu1  ;;  %v300_v0 = vadd.f32 %v299_v61, %v1028_v21 }
  0xc8   : > { %v396_v54 = vsel %vm395_vm10, %v801_v28, %v392_v51 }
  0xc9   : > { %v407_v56 = vmul.f32 %v396_v54, %v1038_v38  ;;  %v406_v59 = vsel %vm405_vm12, %v803_v29, %v402_v52  ;;  %v335_v38 = vadd.f32 %v334_v62, %v1028_v21 }
  0xca   : > { %v408_v48 = vmul.f32 %v406_v59, %v1040_v39 }
  0xcb   : > { %484 = vmatpush.xpose.msra.mxu2 %v407_v56  ;;  %v466_v39 = vadd.f32 %v335_v38, %v300_v0 }
  0xcc   : > { %513 = vmatpush.xpose.msra.mxu3 %v408_v48  ;;  %v409_v63 = vadd.f32 %v408_v48, %v407_v56 }
  0xce   : > { %410 = vadd.xlane.f32.xlu0 %v409_v63  ;;  %485 = vmatmul.f32.vlgmr.msra.gmra.mxu2 %v1051_v57 }
  0xcf   : > { %555 = vmatpush.msrb.mxu2 %v371_v60  ;;  %514 = vmatmul.f32.vlgmr.msra.gmra.mxu3 %v1054_v58 }
  0xd0   : > { %584 = vmatpush.msrb.mxu3 %v372_v49 }
  0xd6   : > { %488 = vmatmul.f32.gmra.mxu2 %v1059_v16  ;;  %467 = vadd.xlane.f32.xlu0 %v466_v39 }
  0xd7   : > { %517 = vmatmul.f32.gmra.mxu3 %v1061_v17 }
  0xde   : > { %491 = vmatmul.f32.gmra.mxu2 %v297_v35 }
  0xdf   : > { %520 = vmatmul.f32.gmra.mxu3 %v332_v36 }
  0xe6   : > { %494 = vmatmul.f32.gmra.mxu2 %v300_v0 }
  0xe7   : > { %523 = vmatmul.f32.gmra.mxu3 %v335_v38 }
 0x127   : > { %v459_v59 = vpop.xlane.xlu1 %458 }
 0x141   : > { %v411_v16 = vpop.xlane.xlu0 %410 }
 0x142   : > { %v412_v17 = vadd.f32 1e-06, %v411_v16 }
 0x144   : > { %v413_v18 = vmul.f32 %v412_v17, %v371_v60  ;;  %v414_v19 = vmul.f32 %v412_v17, %v372_v49 }
 0x146   : > { %v415_v20 = vrot.slane %v413_v18, 4  ;;  %v421_v22 = vrot.slane %v414_v19, 4 }
 0x148   : > { %v416_v23 = vadd.f32 %v415_v20, %v413_v18  ;;  %v422_v24 = vadd.f32 %v421_v22, %v414_v19 }
 0x14a   : > { %v417_v27 = vrot.slane %v416_v23, 2  ;;  %v423_v28 = vrot.slane %v422_v24, 2 }
 0x14c   : > { %v418_v29 = vadd.f32 %v417_v27, %v416_v23  ;;  %v424_v30 = vadd.f32 %v423_v28, %v422_v24 }
 0x14e   : > { %v419_v31 = vrot.slane %v418_v29, 1  ;;  %v425_v32 = vrot.slane %v424_v30, 1 }
 0x150   : > { %v420_v33 = vadd.f32 %v419_v31, %v418_v29  ;;  %v426_v34 = vadd.f32 %v425_v32, %v424_v30 }
 0x151   : > { %v486_v25 = vpop.f32.mrf.mxu2 }
 0x152   : > { %v515_v26 = vpop.f32.mrf.mxu3  ;;  %v427_v35 = vadd.f32 256.0, %v420_v33  ;;  %v428_v36 = vadd.f32 256.0, %v426_v34  ;;  %v468_v33 = vpop.xlane.xlu0 %467 }
 0x153   : > { %v516_v57 = vadd.f32 %v515_v26, %v486_v25  ;;  %v614_v25 = vstv %s197_s13 }
 0x154   : > { %804 = vrcp.f32 %v427_v35  ;;  %vm434_vm0 = vweird.f32 %v427_v35  ;;  %v440_v51 = vand.u32 2147483648, %v427_v35  ;;  %v454_v52 = vand.u32 2147483648, %v428_v36 }
 0x155   : > { %736 = vmatmul.msk.f32.vlgmr.msrb.gmra.mxu2 %vm527_vm13, %v516_v57  ;;  %740 = vmatmul.msk.f32.vlgmr.msrb.gmra.mxu3 %vm527_vm13, %v516_v57  ;;  %806 = vrcp.f32 %v428_v36  ;;  %v438_v54 = vand.u32 2147483647, %v427_v35  ;;  %vm448_vm2 = vweird.f32 %v428_v36  ;;  %v452_v55 = vand.u32 2147483647, %v428_v36 }
 0x156   : > { %v441_v49 = vor.u32 1.1754944e-38, %v440_v51  ;;  %v455_v62 = vor.u32 1.1754944e-38, %v454_v52 }
 0x157   : > { %vm439_vm4 = vcmp.eq.f32.partialorder %v438_v54, 8.507059e+37  ;;  %vm453_vm5 = vcmp.eq.f32.partialorder %v452_v55, 8.507059e+37 }
 0x159   : > { %v489_v21 = vpop.f32.mrf.mxu2 }
 0x15a   : > { %v518_v58 = vpop.f32.mrf.mxu3  ;;  %v805_v37 = vpop.eup %804 }
 0x15b   : > { %v519_v1 = vadd.f32 %v518_v58, %v489_v21  ;;  %v807_v40 = vpop.eup %806  ;;  %v430_v41 = vmul.f32 %v805_v37, %v427_v35  ;;  %vm435_vm14 = vweird.f32 %v805_v37  ;;  %v462_v58 = vpop.xlane.xlu2 %461 }
 0x15c   : > { %v444_v42 = vmul.f32 %v807_v40, %v428_v36  ;;  %vm449_vm15 = vweird.f32 %v807_v40  ;;  %vm1086_vm1 = vmor %vm434_vm0, %vm435_vm14 }
 0x15d   : > { %737 = vmatmul.msk.f32.gmra.mxu2 %vm527_vm13, %v519_v1  ;;  %741 = vmatmul.msk.f32.gmra.mxu3 %vm527_vm13, %v519_v1  ;;  %v431_v43 = vsub.f32 1.0, %v430_v41  ;;  %vm1090_vm3 = vmor %vm448_vm2, %vm449_vm15 }
 0x15e   : > { %v445_v44 = vsub.f32 1.0, %v444_v42 }
 0x15f   : > { %v432_v45 = vmul.f32 %v805_v37, %v431_v43 }
 0x160   : > { %v446_v46 = vmul.f32 %v807_v40, %v445_v44 }
 0x161   : > { %v492_v2 = vpop.f32.mrf.mxu2  ;;  %v433_v47 = vadd.f32 %v805_v37, %v432_v45 }
 0x162   : > { %v521_v7 = vpop.f32.mrf.mxu3  ;;  %v447_v50 = vadd.f32 %v807_v40, %v446_v46 }
 0x163   : > { %v522_v8 = vadd.f32 %v521_v7, %v492_v2  ;;  %v437_v48 = vsel %vm1086_vm1, %v805_v37, %v433_v47 }
 0x164   : > { %v451_v60 = vsel %vm1090_vm3, %v807_v40, %v447_v50  ;;  %v442_v39 = vsel %vm439_vm4, %v441_v49, %v437_v48 }
 0x165   : > { %738 = vmatmul.msk.f32.gmra.mxu2 %vm527_vm13, %v522_v8  ;;  %742 = vmatmul.msk.f32.gmra.mxu3 %vm527_vm13, %v522_v8  ;;  %v456_v26 = vsel %vm453_vm5, %v455_v62, %v451_v60 }
 0x169   : > { %v495_v13 = vpop.f32.mrf.mxu2 }
 0x16a   : > { %v524_v14 = vpop.f32.mrf.mxu3 }
 0x16b   : > { %v525_v15 = vadd.f32 %v524_v14, %v495_v13 }
 0x16d   : > { %739 = vmatmul.msk.f32.gmra.mxu2 %vm527_vm13, %v525_v15  ;;  %743 = vmatmul.msk.f32.gmra.mxu3 %vm527_vm13, %v525_v15 }
 0x1d8   : > { %v557_v61 = vpop.f32.mrf.mxu2  ;;  %v586_v63 = vpop.f32.mrf.mxu3 }
 0x1d9   : > { %v598_v0 = vadd.f32 %v557_v61, %v459_v59  ;;  %v599_v38 = vadd.f32 %v586_v63, %v459_v59 }
 0x1db   : > { %v606_v57 = vmul.f32 %v598_v0, %v442_v39  ;;  %v607_v21 = vmul.f32 %v599_v38, %v456_v26 }
 0x1dd   : > { %v615_v1 = vmul.f32 %v614_v25, %v606_v57  ;;  %v616_v2 = vmul.f32 %v614_v25, %v607_v21 }
 0x1df   : > { %v623_v7 = vadd.f32 %v615_v1, %v984_v11  ;;  %v624_v8 = vadd.f32 %v616_v2, %v986_v12  ;;  %v465_v11 = vpop.xlane.xlu2 %464 }
 0x1e0   : > { %v560_v13 = vpop.f32.mrf.mxu2  ;;  %v589_v14 = vpop.f32.mrf.mxu3 }
 0x1e1   : > { %631 = vst [vmem:[%s1103_s16] sm:$0xff] %v623_v7  ;;  %v600_v15 = vadd.f32 %v560_v13, %v462_v58  ;;  %v601_v16 = vadd.f32 %v589_v14, %v462_v58 }
 0x1e2   : > { %632 = vst [vmem:[%s1103_s16 + $0x8] sm:$0xff] %v624_v8 }
 0x1e3   : > { %v608_v17 = vmul.f32 %v600_v15, %v442_v39  ;;  %v609_v18 = vmul.f32 %v601_v16, %v456_v26 }
 0x1e5   : > { %v617_v19 = vmul.f32 %v614_v25, %v608_v17  ;;  %v618_v20 = vmul.f32 %v614_v25, %v609_v18 }
 0x1e7   : > { %v625_v12 = vadd.f32 %v617_v19, %v978_v9  ;;  %v626_v22 = vadd.f32 %v618_v20, %v980_v10 }
 0x1e8   : > { %v563_v23 = vpop.f32.mrf.mxu2  ;;  %v592_v24 = vpop.f32.mrf.mxu3 }
 0x1e9   : > { %633 = vst [vmem:[%s1103_s16 + $0x10] sm:$0xff] %v625_v12  ;;  %v602_v27 = vadd.f32 %v563_v23, %v465_v11  ;;  %v603_v28 = vadd.f32 %v592_v24, %v465_v11 }
 0x1ea   : > { %634 = vst [vmem:[%s1103_s16 + $0x18] sm:$0xff] %v626_v22 }
 0x1eb   : > { %v610_v29 = vmul.f32 %v602_v27, %v442_v39  ;;  %v611_v30 = vmul.f32 %v603_v28, %v456_v26 }
 0x1ed   : > { %v619_v31 = vmul.f32 %v614_v25, %v610_v29  ;;  %v620_v32 = vmul.f32 %v614_v25, %v611_v30 }
 0x1ef   : > { %v627_v34 = vadd.f32 %v619_v31, %v966_v5  ;;  %v628_v9 = vadd.f32 %v620_v32, %v970_v6 }
 0x1f0   : > { %v566_v10 = vpop.f32.mrf.mxu2  ;;  %v595_v35 = vpop.f32.mrf.mxu3 }
 0x1f1   : > { %635 = vst [vmem:[%s1103_s16 + $0x20] sm:$0xff] %v627_v34  ;;  %v604_v36 = vadd.f32 %v566_v10, %v468_v33  ;;  %v605_v37 = vadd.f32 %v595_v35, %v468_v33 }
 0x1f2   : > { %636 = vst [vmem:[%s1103_s16 + $0x28] sm:$0xff] %v628_v9 }
 0x1f3   : > { %v612_v40 = vmul.f32 %v604_v36, %v442_v39  ;;  %v613_v41 = vmul.f32 %v605_v37, %v456_v26 }
 0x1f5   : > { %v621_v5 = vmul.f32 %v614_v25, %v612_v40  ;;  %v622_v6 = vmul.f32 %v614_v25, %v613_v41 }
 0x1f7   : > { %v629_v42 = vadd.f32 %v621_v5, %v962_v3  ;;  %v630_v43 = vadd.f32 %v622_v6, %v964_v4 }
 0x1f9   : > { %637 = vst [vmem:[%s1103_s16 + $0x30] sm:$0xff] %v629_v42 }
 0x1fa   : > { %638 = vst [vmem:[%s1103_s16 + $0x38] sm:$0xff] %v630_v43 }
 0x1fb   : > { %835 = shalt.err (!%p832_p3)
}
 0x1fc   : > { %s873_s12 = smov 256   ;;  %s874_s13 = smov 16  }
 0x1fd   : > { %751 = dma.vmem_to_hbm [thread:$0]  (%p941_p5), %s653_s3, 1024, %s655_s29, %s640_s30, %s873_s12, %s873_s12, %s874_s13  }
 0x1fe PF: > { %p757_p4 = scmp.ge.s32.totalorder %s870_s20, 2  ;;  %s669_s14 = sand.u32 1, %s858_s17  }
 0x1ff   : > { %s670_s15 = scalar_lea.sflag [#allocation4], %s669_s14 }
 0x200   : > { %p754_p7 = pnand %p757_p4, %p945_p6 }
 0x202   : > { %p755_p8 = pneg %p754_p7 }
 0x204   : > { %853 = dma.done.wait (%p755_p8), %s670_s15, 1024  }
 0x205   : > { %855 = vsyncadd (%p755_p8), %s670_s15, 4294966272  ;;  %p15_p9 = scmp.ge.s32.totalorder %s928_s22, 4   ;;  %s1164_s17 = smov %s862_s18 }
 0x206   : > { %s1165_s18 = smov %s866_s19  ;;  %s1166_s19 = smov %s939_s25 }
 0x207   : > { %s1167_s20 = smov %s928_s22  ;;  %17 = sbr.rel (!%p15_p9) target bundleno = 5 (0x5), region = 71 }
 0x20c   :  { %676 = vsyncpa [#allocation4], 1 }
 0x20d   :  { %678 = vsyncpa [#allocation4 + $0x1], 1 }

</bundles_post_ra>
